<compile_context>
chip_gen: v7x
topology: tpu7x:2x2x1
jax: 0.10.0
libtpu: 0.0.40
codegen_flags: <defaults>
</compile_context>

<pallas_src>
import math
import functools

import jax
import jax.numpy as jnp
from jax.experimental import pallas as pl
from jax.experimental.pallas import tpu as pltpu


# ---------------------------------------------------------------------------
# Pallas kernel: one batch element per grid step, lane-dense 2D projections.
# ---------------------------------------------------------------------------
def _attention_kernel(q_ref, k_ref, v_ref,
                      wq_ref, bq_ref,
                      wk_ref, bk_ref,
                      wv_ref, bv_ref,
                      wo_ref, bo_ref,
                      out_ref,
                      *, num_heads: int, head_dim: int, compute_dtype):
    H, hd = num_heads, head_dim
    Nq = q_ref.shape[1]
    Nk = k_ref.shape[1]
    D = H * hd
    cdt = compute_dtype

    # Cast activations to the MXU operand dtype after the DMA (in-kernel).
    q2 = q_ref[0].astype(cdt)                                   # (Nq, E)
    k2 = k_ref[0].astype(cdt)                                   # (Nk, E)
    v2 = v_ref[0].astype(cdt)                                   # (Nk, E)

    # Lane-dense 2D input projections (MXU), f32 accumulation + f32 bias.
    # 1/sqrt(head_dim) is pre-folded into wq_ref / bq_ref by the wrapper.
    qh = jnp.dot(q2, wq_ref[...], preferred_element_type=jnp.float32) + bq_ref[...]
    kh = jnp.dot(k2, wk_ref[...], preferred_element_type=jnp.float32) + bk_ref[...]
    vh = jnp.dot(v2, wv_ref[...], preferred_element_type=jnp.float32) + bv_ref[...]

    # Split heads only for the score / PV contractions (f32 relayout, then
    # cast the matmul operands). Columns of D are already head-grouped.
    qh3 = jnp.transpose(qh.reshape(Nq, H, hd), (1, 0, 2)).astype(cdt)  # (H,Nq,hd)
    kh3 = jnp.transpose(kh.reshape(Nk, H, hd), (1, 0, 2)).astype(cdt)  # (H,Nk,hd)
    vh3 = jnp.transpose(vh.reshape(Nk, H, hd), (1, 0, 2)).astype(cdt)  # (H,Nk,hd)

    # Head-batched scores + numerically stable softmax (all f32 on VPU/EUP).
    s = jnp.einsum("hqd,hkd->hqk", qh3, kh3,
                   preferred_element_type=jnp.float32)          # (H, Nq, Nk)
    s = s - jnp.max(s, axis=-1, keepdims=True)
    p = jnp.exp(s)
    p = p * pl.reciprocal(jnp.sum(p, axis=-1, keepdims=True), approx=True)

    # Attention-weighted values, recombined to lane-dense (Nq, D).
    o = jnp.einsum("hqk,hkd->hqd", p.astype(cdt), vh3,
                   preferred_element_type=jnp.float32)          # (H, Nq, hd)
    o2 = jnp.transpose(o, (1, 0, 2)).reshape(Nq, D).astype(cdt)

    # Single out-projection matmul against the 128-lane-padded weight.
    out = jnp.dot(o2, wo_ref[...], preferred_element_type=jnp.float32) + bo_ref[...]
    out_ref[0] = out.astype(out_ref.dtype)                      # unmasked vst


# ---------------------------------------------------------------------------
# Wrapper: weight prep (scale folding, dtype casts, lane-dense padding)
# ---------------------------------------------------------------------------
def attention_pallas(q, k, v, params, *, num_heads: int,
                     compute_dtype=jnp.bfloat16):
    """q: (B, Nq, E), k/v: (B, Nk, E). Returns (B, Nq, E_out)."""
    B, Nq, E = q.shape
    _, Nk, _ = k.shape
    D = params["wq"].shape[1]            # internal_dim
    hd = D // num_heads
    E_out = params["wo"].shape[1]        # embedding_dim
    Ep = ((E_out + 127) // 128) * 128    # lane-dense output width

    scale = 1.0 / math.sqrt(hd)

    # One-time, tiny weight transforms (stay in the XLA wrapper):
    #  - fold 1/sqrt(hd) into the q projection,
    #  - cast MXU operands to compute_dtype, keep biases f32,
    #  - zero-pad the out-projection to a 128-multiple output width.
    wq = (params["wq"] * scale).astype(compute_dtype)
    bq = (params["bq"] * scale).astype(jnp.float32)
    wk = params["wk"].astype(compute_dtype)
    bk = params["bk"].astype(jnp.float32)
    wv = params["wv"].astype(compute_dtype)
    bv = params["bv"].astype(jnp.float32)
    wo = jnp.pad(params["wo"], ((0, 0), (0, Ep - E_out))).astype(compute_dtype)
    bo = jnp.pad(params["bo"], ((0, 0), (0, Ep - E_out))).astype(jnp.float32)

    kernel = functools.partial(_attention_kernel, num_heads=num_heads,
                               head_dim=hd, compute_dtype=compute_dtype)

    def rep(shape):  # replicated (full-array) spec for weights/biases
        return pl.BlockSpec(shape, lambda b: (0,) * len(shape))

    out_padded = pl.pallas_call(
        kernel,
        out_shape=jax.ShapeDtypeStruct((B, Nq, Ep), q.dtype),
        grid_spec=pltpu.PrefetchScalarGridSpec(
            num_scalar_prefetch=0,
            grid=(B,),
            in_specs=[
                pl.BlockSpec((1, Nq, E), lambda b: (b, 0, 0)),   # q
                pl.BlockSpec((1, Nk, E), lambda b: (b, 0, 0)),   # k
                pl.BlockSpec((1, Nk, E), lambda b: (b, 0, 0)),   # v
                rep((E, D)), rep((1, D)),                        # q_proj
                rep((E, D)), rep((1, D)),                        # k_proj
                rep((E, D)), rep((1, D)),                        # v_proj
                rep((D, Ep)), rep((1, Ep)),                      # out_proj
            ],
            out_specs=pl.BlockSpec((1, Nq, Ep), lambda b: (b, 0, 0)),
        ),
        compiler_params=pltpu.CompilerParams(
            dimension_semantics=("parallel",)),   # 2 steps -> both v7x TCs
    )(q, k, v, wq, bq, wk, bk, wv, bv, wo, bo)

    return out_padded[..., :E_out]


# ---------------------------------------------------------------------------
# Pure-JAX reference (mirrors the PyTorch module exactly)
# ---------------------------------------------------------------------------
def attention_ref(q, k, v, params, *, num_heads: int):
    def separate_heads(x):
        b, n, c = x.shape
        return x.reshape(b, n, num_heads, c // num_heads).transpose(0, 2, 1, 3)

    qp = q @ params["wq"] + params["bq"][0]
    kp = k @ params["wk"] + params["bk"][0]
    vp = v @ params["wv"] + params["bv"][0]
    qh, kh, vh = separate_heads(qp), separate_heads(kp), separate_heads(vp)
    c_per_head = qh.shape[-1]
    attn = jnp.einsum("bhqd,bhkd->bhqk", qh, kh) / math.sqrt(c_per_head)
    attn = jax.nn.softmax(attn, axis=-1)
    out = jnp.einsum("bhqk,bhkd->bhqd", attn, vh)
    b, h, n, d = out.shape
    out = out.transpose(0, 2, 1, 3).reshape(b, n, h * d)
    return out @ params["wo"] + params["bo"][0]


# ---------------------------------------------------------------------------
# Deterministic parameter init (shapes follow nn.Linear in the module)
# ---------------------------------------------------------------------------
def init_params(key, embedding_dim, internal_dim, dtype=jnp.float32):
    ks = jax.random.split(key, 8)
    s_in = 1.0 / math.sqrt(embedding_dim)
    s_int = 1.0 / math.sqrt(internal_dim)
    return {
        # stored as (in, out) so y = x @ W + b
        "wq": jax.random.uniform(ks[0], (embedding_dim, internal_dim), dtype, -s_in, s_in),
        "bq": jax.random.uniform(ks[1], (1, internal_dim), dtype, -s_in, s_in),
        "wk": jax.random.uniform(ks[2], (embedding_dim, internal_dim), dtype, -s_in, s_in),
        "bk": jax.random.uniform(ks[3], (1, internal_dim), dtype, -s_in, s_in),
        "wv": jax.random.uniform(ks[4], (embedding_dim, internal_dim), dtype, -s_in, s_in),
        "bv": jax.random.uniform(ks[5], (1, internal_dim), dtype, -s_in, s_in),
        "wo": jax.random.uniform(ks[6], (internal_dim, embedding_dim), dtype, -s_int, s_int),
        "bo": jax.random.uniform(ks[7], (1, embedding_dim), dtype, -s_int, s_int),
    }


if __name__ == "__main__":
    # Small shapes consistent with the module's forward:
    # embedding_dim=32, num_heads=4, downsample_rate=1 -> internal_dim=32
    B, Nq, Nk, E = 2, 8, 16, 32
    NUM_HEADS = 4
    DOWNSAMPLE_RATE = 1
    D = E // DOWNSAMPLE_RATE
    assert D % NUM_HEADS == 0

    key = jax.random.PRNGKey(0)
    kq, kk, kv, kp = jax.random.split(key, 4)
    q = jax.random.normal(kq, (B, Nq, E), jnp.float32)
    k = jax.random.normal(kk, (B, Nk, E), jnp.float32)
    v = jax.random.normal(kv, (B, Nk, E), jnp.float32)
    params = init_params(kp, E, D)

    ref = attention_ref(q, k, v, params, num_heads=NUM_HEADS)

    # f32-operand path: tight check (tolerance covers the approx EUP recip).
    out_f32 = jax.block_until_ready(
        attention_pallas(q, k, v, params, num_heads=NUM_HEADS,
                         compute_dtype=jnp.float32))
    assert out_f32.shape == (B, Nq, E)
    err_f32 = jnp.max(jnp.abs(out_f32 - ref))
    assert jnp.allclose(out_f32, ref, rtol=5e-3, atol=5e-3), (
        f"f32 max abs err = {err_f32}")

    # Default path: bf16 MXU operands, f32 accumulation, f32 softmax.
    out_bf16 = jax.block_until_ready(
        attention_pallas(q, k, v, params, num_heads=NUM_HEADS))
    assert out_bf16.shape == (B, Nq, E)
    err_bf16 = jnp.max(jnp.abs(out_bf16 - ref))
    assert jnp.allclose(out_bf16, ref, rtol=1e-1, atol=1e-1), (
        f"bf16 max abs err = {err_bf16}")

    print("KERNEL_OK")
</pallas_src>

<mosaic_0001>
module attributes {stable_mosaic.version = 11 : i64} {
  func.func @_attention_kernel(%arg0: i32, %arg1: memref<1x8x32xf32, #tpu.memory_space<vmem>>, %arg2: memref<1x16x32xf32, #tpu.memory_space<vmem>>, %arg3: memref<1x16x32xf32, #tpu.memory_space<vmem>>, %arg4: memref<32x32xf32, #tpu.memory_space<vmem>>, %arg5: memref<1x32xf32, #tpu.memory_space<vmem>>, %arg6: memref<32x32xf32, #tpu.memory_space<vmem>>, %arg7: memref<1x32xf32, #tpu.memory_space<vmem>>, %arg8: memref<32x32xf32, #tpu.memory_space<vmem>>, %arg9: memref<1x32xf32, #tpu.memory_space<vmem>>, %arg10: memref<32x128xf32, #tpu.memory_space<vmem>>, %arg11: memref<1x128xf32, #tpu.memory_space<vmem>>, %arg12: memref<1x8x128xf32, #tpu.memory_space<vmem>>) attributes {dimension_semantics = [#tpu.dimension_semantics<parallel>], iteration_bounds = array<i64: 2>, scalar_prefetch = 0 : i64, scratch_operands = 0 : i64, tpu.core_type = #tpu.core_type<tc>, window_params = [{transform_indices = @transform_0, window_bounds = array<i64: 1, 8, 32>}, {transform_indices = @transform_1, window_bounds = array<i64: 1, 16, 32>}, {transform_indices = @transform_2, window_bounds = array<i64: 1, 16, 32>}, {pipeline_mode = #tpu.pipeline_mode<synchronous>, transform_indices = @transform_3, window_bounds = array<i64: 32, 32>}, {pipeline_mode = #tpu.pipeline_mode<synchronous>, transform_indices = @transform_4, window_bounds = array<i64: 1, 32>}, {pipeline_mode = #tpu.pipeline_mode<synchronous>, transform_indices = @transform_5, window_bounds = array<i64: 32, 32>}, {pipeline_mode = #tpu.pipeline_mode<synchronous>, transform_indices = @transform_6, window_bounds = array<i64: 1, 32>}, {pipeline_mode = #tpu.pipeline_mode<synchronous>, transform_indices = @transform_7, window_bounds = array<i64: 32, 32>}, {pipeline_mode = #tpu.pipeline_mode<synchronous>, transform_indices = @transform_8, window_bounds = array<i64: 1, 32>}, {pipeline_mode = #tpu.pipeline_mode<synchronous>, transform_indices = @transform_9, window_bounds = array<i64: 32, 128>}, {pipeline_mode = #tpu.pipeline_mode<synchronous>, transform_indices = @transform_10, window_bounds = array<i64: 1, 128>}, {transform_indices = @transform_11, window_bounds = array<i64: 1, 8, 128>}]} {
    %c0 = arith.constant 0 : index
    %c0_0 = arith.constant 0 : index
    %c0_1 = arith.constant 0 : index
    %0 = vector.load %arg1[%c0, %c0_0, %c0_1] : memref<1x8x32xf32, #tpu.memory_space<vmem>>, vector<1x8x32xf32>
    %1 = vector.shape_cast %0 : vector<1x8x32xf32> to vector<8x32xf32>
    %c0_2 = arith.constant 0 : index
    %c0_3 = arith.constant 0 : index
    %c0_4 = arith.constant 0 : index
    %2 = vector.load %arg2[%c0_2, %c0_3, %c0_4] : memref<1x16x32xf32, #tpu.memory_space<vmem>>, vector<1x16x32xf32>
    %3 = vector.shape_cast %2 : vector<1x16x32xf32> to vector<16x32xf32>
    %c0_5 = arith.constant 0 : index
    %c0_6 = arith.constant 0 : index
    %c0_7 = arith.constant 0 : index
    %4 = vector.load %arg3[%c0_5, %c0_6, %c0_7] : memref<1x16x32xf32, #tpu.memory_space<vmem>>, vector<1x16x32xf32>
    %5 = vector.shape_cast %4 : vector<1x16x32xf32> to vector<16x32xf32>
    %c0_8 = arith.constant 0 : index
    %c0_9 = arith.constant 0 : index
    %6 = vector.load %arg4[%c0_8, %c0_9] : memref<32x32xf32, #tpu.memory_space<vmem>>, vector<32x32xf32>
    %cst = arith.constant dense<0.000000e+00> : vector<8x32xf32>
    %7 = tpu.matmul %1, %6, %cst {dimension_numbers = #tpu.dot_dimension_numbers<[1], [0], [0], [1], [0, 0, 1, 1], [], []>} : vector<8x32xf32>, vector<32x32xf32>, vector<8x32xf32> -> vector<8x32xf32>
    %c0_10 = arith.constant 0 : index
    %c0_11 = arith.constant 0 : index
    %8 = vector.load %arg5[%c0_10, %c0_11] : memref<1x32xf32, #tpu.memory_space<vmem>>, vector<1x32xf32>
    %9 = vector.broadcast %8 : vector<1x32xf32> to vector<8x32xf32>
    %10 = arith.addf %7, %9 : vector<8x32xf32>
    %c0_12 = arith.constant 0 : index
    %c0_13 = arith.constant 0 : index
    %11 = vector.load %arg6[%c0_12, %c0_13] : memref<32x32xf32, #tpu.memory_space<vmem>>, vector<32x32xf32>
    %cst_14 = arith.constant dense<0.000000e+00> : vector<16x32xf32>
    %12 = tpu.matmul %3, %11, %cst_14 {dimension_numbers = #tpu.dot_dimension_numbers<[1], [0], [0], [1], [0, 0, 1, 1], [], []>} : vector<16x32xf32>, vector<32x32xf32>, vector<16x32xf32> -> vector<16x32xf32>
    %c0_15 = arith.constant 0 : index
    %c0_16 = arith.constant 0 : index
    %13 = vector.load %arg7[%c0_15, %c0_16] : memref<1x32xf32, #tpu.memory_space<vmem>>, vector<1x32xf32>
    %14 = vector.broadcast %13 : vector<1x32xf32> to vector<16x32xf32>
    %15 = arith.addf %12, %14 : vector<16x32xf32>
    %c0_17 = arith.constant 0 : index
    %c0_18 = arith.constant 0 : index
    %16 = vector.load %arg8[%c0_17, %c0_18] : memref<32x32xf32, #tpu.memory_space<vmem>>, vector<32x32xf32>
    %cst_19 = arith.constant dense<0.000000e+00> : vector<16x32xf32>
    %17 = tpu.matmul %5, %16, %cst_19 {dimension_numbers = #tpu.dot_dimension_numbers<[1], [0], [0], [1], [0, 0, 1, 1], [], []>} : vector<16x32xf32>, vector<32x32xf32>, vector<16x32xf32> -> vector<16x32xf32>
    %c0_20 = arith.constant 0 : index
    %c0_21 = arith.constant 0 : index
    %18 = vector.load %arg9[%c0_20, %c0_21] : memref<1x32xf32, #tpu.memory_space<vmem>>, vector<1x32xf32>
    %19 = vector.broadcast %18 : vector<1x32xf32> to vector<16x32xf32>
    %20 = arith.addf %17, %19 : vector<16x32xf32>
    %21 = vector.shape_cast %10 : vector<8x32xf32> to vector<8x4x8xf32>
    %22 = tpu.transpose %21, [1, 0, 2] : vector<8x4x8xf32> -> vector<4x8x8xf32>
    %23 = vector.shape_cast %15 : vector<16x32xf32> to vector<16x4x8xf32>
    %24 = tpu.transpose %23, [1, 0, 2] : vector<16x4x8xf32> -> vector<4x16x8xf32>
    %25 = vector.shape_cast %20 : vector<16x32xf32> to vector<16x4x8xf32>
    %26 = tpu.transpose %25, [1, 0, 2] : vector<16x4x8xf32> -> vector<4x16x8xf32>
    "tpu.trace_start"() <{level = 10 : i32, message = "hqd,hkd->hqk"}> : () -> ()
    %cst_22 = arith.constant dense<0.000000e+00> : vector<4x8x16xf32>
    %27 = tpu.matmul %22, %24, %cst_22 {dimension_numbers = #tpu.dot_dimension_numbers<[2], [2], [1], [1], [0, 0, 0, 1, 1, 1], [0], [0]>} : vector<4x8x8xf32>, vector<4x16x8xf32>, vector<4x8x16xf32> -> vector<4x8x16xf32>
    "tpu.trace_stop"() : () -> ()
    %cst_23 = arith.constant dense<0xFF800000> : vector<4x8xf32>
    %28 = vector.multi_reduction <maximumf>, %27, %cst_23 [2] : vector<4x8x16xf32> to vector<4x8xf32>
    %29 = vector.shape_cast %28 : vector<4x8xf32> to vector<4x8x1xf32>
    %30 = vector.broadcast %29 : vector<4x8x1xf32> to vector<4x8x16xf32>
    %31 = arith.subf %27, %30 : vector<4x8x16xf32>
    %32 = math.exp %31 : vector<4x8x16xf32>
    %cst_24 = arith.constant dense<0.000000e+00> : vector<4x8xf32>
    %33 = vector.multi_reduction <add>, %32, %cst_24 [2] : vector<4x8x16xf32> to vector<4x8xf32>
    %34 = vector.shape_cast %33 : vector<4x8xf32> to vector<4x8x1xf32>
    %35 = tpu.reciprocal %34 {approx = true} : vector<4x8x1xf32> -> vector<4x8x1xf32>
    %36 = vector.broadcast %35 : vector<4x8x1xf32> to vector<4x8x16xf32>
    %37 = arith.mulf %32, %36 : vector<4x8x16xf32>
    "tpu.trace_start"() <{level = 10 : i32, message = "hqk,hkd->hqd"}> : () -> ()
    %cst_25 = arith.constant dense<0.000000e+00> : vector<4x8x8xf32>
    %38 = tpu.matmul %37, %26, %cst_25 {dimension_numbers = #tpu.dot_dimension_numbers<[2], [1], [1], [2], [0, 0, 0, 1, 1, 2], [0], [0]>} : vector<4x8x16xf32>, vector<4x16x8xf32>, vector<4x8x8xf32> -> vector<4x8x8xf32>
    "tpu.trace_stop"() : () -> ()
    %39 = tpu.transpose %38, [1, 0, 2] : vector<4x8x8xf32> -> vector<8x4x8xf32>
    %40 = vector.shape_cast %39 : vector<8x4x8xf32> to vector<8x32xf32>
    %c0_26 = arith.constant 0 : index
    %c0_27 = arith.constant 0 : index
    %41 = vector.load %arg10[%c0_26, %c0_27] : memref<32x128xf32, #tpu.memory_space<vmem>>, vector<32x128xf32>
    %cst_28 = arith.constant dense<0.000000e+00> : vector<8x128xf32>
    %42 = tpu.matmul %40, %41, %cst_28 {dimension_numbers = #tpu.dot_dimension_numbers<[1], [0], [0], [1], [0, 0, 1, 1], [], []>} : vector<8x32xf32>, vector<32x128xf32>, vector<8x128xf32> -> vector<8x128xf32>
    %c0_29 = arith.constant 0 : index
    %c0_30 = arith.constant 0 : index
    %43 = vector.load %arg11[%c0_29, %c0_30] : memref<1x128xf32, #tpu.memory_space<vmem>>, vector<1x128xf32>
    %44 = vector.broadcast %43 : vector<1x128xf32> to vector<8x128xf32>
    %45 = arith.addf %42, %44 : vector<8x128xf32>
    %c0_31 = arith.constant 0 : index
    %c0_32 = arith.constant 0 : index
    %c0_33 = arith.constant 0 : index
    %46 = vector.load %arg12[%c0_31, %c0_32, %c0_33] : memref<1x8x128xf32, #tpu.memory_space<vmem>>, vector<1x8x128xf32>
    %47 = vector.shape_cast %46 : vector<1x8x128xf32> to vector<8x128xf32>
    %48 = vector.shape_cast %45 : vector<8x128xf32> to vector<1x8x128xf32>
    tpu.vector_store %arg12[%c0_31, %c0_32, %c0_33], %48 {strides = array<i32>} : memref<1x8x128xf32, #tpu.memory_space<vmem>>, vector<1x8x128xf32>,
    return
  }
  func.func @transform_0(%arg0: i32) -> (i32, i32, i32) {
    %c0_i32 = arith.constant 0 : i32
    %c0_i32_0 = arith.constant 0 : i32
    %c0_i32_1 = arith.constant 0 : i32
    return %arg0, %c0_i32, %c0_i32_0 : i32, i32, i32
  }
  func.func @transform_1(%arg0: i32) -> (i32, i32, i32) {
    %c0_i32 = arith.constant 0 : i32
    %c0_i32_0 = arith.constant 0 : i32
    %c0_i32_1 = arith.constant 0 : i32
    return %arg0, %c0_i32, %c0_i32_0 : i32, i32, i32
  }
  func.func @transform_2(%arg0: i32) -> (i32, i32, i32) {
    %c0_i32 = arith.constant 0 : i32
    %c0_i32_0 = arith.constant 0 : i32
    %c0_i32_1 = arith.constant 0 : i32
    return %arg0, %c0_i32, %c0_i32_0 : i32, i32, i32
  }
  func.func @transform_3(%arg0: i32) -> (i32, i32) {
    %c0_i32 = arith.constant 0 : i32
    %c0_i32_0 = arith.constant 0 : i32
    %c0_i32_1 = arith.constant 0 : i32
    return %c0_i32, %c0_i32_0 : i32, i32
  }
  func.func @transform_4(%arg0: i32) -> (i32, i32) {
    %c0_i32 = arith.constant 0 : i32
    %c0_i32_0 = arith.constant 0 : i32
    %c0_i32_1 = arith.constant 0 : i32
    return %c0_i32, %c0_i32_0 : i32, i32
  }
  func.func @transform_5(%arg0: i32) -> (i32, i32) {
    %c0_i32 = arith.constant 0 : i32
    %c0_i32_0 = arith.constant 0 : i32
    %c0_i32_1 = arith.constant 0 : i32
    return %c0_i32, %c0_i32_0 : i32, i32
  }
  func.func @transform_6(%arg0: i32) -> (i32, i32) {
    %c0_i32 = arith.constant 0 : i32
    %c0_i32_0 = arith.constant 0 : i32
    %c0_i32_1 = arith.constant 0 : i32
    return %c0_i32, %c0_i32_0 : i32, i32
  }
  func.func @transform_7(%arg0: i32) -> (i32, i32) {
    %c0_i32 = arith.constant 0 : i32
    %c0_i32_0 = arith.constant 0 : i32
    %c0_i32_1 = arith.constant 0 : i32
    return %c0_i32, %c0_i32_0 : i32, i32
  }
  func.func @transform_8(%arg0: i32) -> (i32, i32) {
    %c0_i32 = arith.constant 0 : i32
    %c0_i32_0 = arith.constant 0 : i32
    %c0_i32_1 = arith.constant 0 : i32
    return %c0_i32, %c0_i32_0 : i32, i32
  }
  func.func @transform_9(%arg0: i32) -> (i32, i32) {
    %c0_i32 = arith.constant 0 : i32
    %c0_i32_0 = arith.constant 0 : i32
    %c0_i32_1 = arith.constant 0 : i32
    return %c0_i32, %c0_i32_0 : i32, i32
  }
  func.func @transform_10(%arg0: i32) -> (i32, i32) {
    %c0_i32 = arith.constant 0 : i32
    %c0_i32_0 = arith.constant 0 : i32
    %c0_i32_1 = arith.constant 0 : i32
    return %c0_i32, %c0_i32_0 : i32, i32
  }
  func.func @transform_11(%arg0: i32) -> (i32, i32, i32) {
    %c0_i32 = arith.constant 0 : i32
    %c0_i32_0 = arith.constant 0 : i32
    %c0_i32_1 = arith.constant 0 : i32
    return %arg0, %c0_i32, %c0_i32_0 : i32, i32, i32
  }
}

</mosaic_0001>

<bundles_post_ra>
// kernel: tpu_custom_call.1
= control target key start
LH: loop header
LB: loop body
LE: loop exit
PB: predicated region body
PF: predicated region fallthrough
CT: control target
= control target key end

     0   :  { %s3962_s0 = inlined_call_operand.hbm [shape: f32[2,8,32], index: 0, kind: input, shape index: {}]   ;;  %s3963_s1 = inlined_call_operand.hbm [shape: f32[2,16,32], index: 1, kind: input, shape index: {}]   ;;  %s3964_s2 = inlined_call_operand.hbm [shape: f32[2,16,32], index: 2, kind: input, shape index: {}]   ;;  %s3965_s3 = inlined_call_operand.hbm [shape: f32[32,32], index: 3, kind: input, shape index: {}]   ;;  %s3966_s4 = inlined_call_operand.vmem [shape: f32[1,32], index: 4, kind: input, shape index: {}]   ;;  %s3967_s5 = inlined_call_operand.hbm [shape: f32[32,32], index: 5, kind: input, shape index: {}]   ;;  %s3968_s6 = inlined_call_operand.vmem [shape: f32[1,32], index: 6, kind: input, shape index: {}]   ;;  %s3969_s7 = inlined_call_operand.hbm [shape: f32[32,32], index: 7, kind: input, shape index: {}]   ;;  %s3970_s8 = inlined_call_operand.hbm [shape: f32[1,32], index: 8, kind: input, shape index: {}]   ;;  %s3971_s9 = inlined_call_operand.vmem [shape: f32[32,128], index: 9, kind: input, shape index: {}]   ;;  %s3972_s10 = inlined_call_operand.vmem [shape: f32[1,128], index: 10, kind: input, shape index: {}]   ;;  %s3973_s11 = inlined_call_operand.hbm [shape: f32[2,8,128], index: 11, kind: output, shape index: {}]  }
   0x1   :  { %4000 = sst [smem:[#allocation26_spill]] %s3963_s1 }
   0x2   :  { %4001 = sst [smem:[#allocation27_spill]] %s3965_s3 }
   0x3   :  { %4002 = sst [smem:[#allocation28_spill]] %s3966_s4 }
   0x4   :  { %4003 = sst [smem:[#allocation29_spill]] %s3968_s6 }
   0x5   :  { %4004 = sst [smem:[#allocation30_spill]] %s3969_s7 }
   0x6   :  { %4005 = sst [smem:[#allocation31_spill]] %s3971_s9 }
   0x7   :  { %4006 = sst [smem:[#allocation32_spill]] %s3972_s10 }
   0x8   :  { %4007 = sst [smem:[#allocation33_spill]] %s3973_s11 }
   0x9   :  { %16 = vsyncpa [#allocation3], 0 }
   0xa   :  { %18 = vsyncpa [#allocation3 + $0x1], 0 }
   0xb   :  { %19 = vsyncpa [#allocation6], 0 }
   0xc   :  { %21 = vsyncpa [#allocation6 + $0x1], 0 }
   0xd   :  { %22 = vsyncpa [#allocation9], 0 }
   0xe   :  { %23 = vsyncpa [#allocation12], 0 }
   0xf   :  { %24 = vsyncpa [#allocation4], 0 }
  0x10   :  { %26 = vsyncpa [#allocation4 + $0x1], 0  ;;  %s3354_s17 = smov 0   ;;  %s3356_s18 = smov 0  }
  0x11   :  { %s3358_s19 = smov 0   ;;  %s3360_s20 = smov 0  }
  0x12 LB: > { %4008 = sst [smem:[#allocation20_spill]] %s3259_s17  ;;  %s3375_s21 = sadd.s32 4294967295, %s3271_s20   ;;  %s3271_s20 = sphi %s3360_s20, %s4052_s20   ;;  %s3267_s19 = sphi %s3358_s19, %s4054_s19   ;;  %s3263_s18 = sphi %s3356_s18, %s4056_s18   ;;  %s3259_s17 = sphi %s3354_s17, %s4055_s17  }
  0x13   : > { %4009 = sst [smem:[#allocation21_spill]] %s3267_s19  ;;  %s2595_s22 = sadd.s32 4294967294, %s3271_s20  }
  0x14   : > { %p52_p0 = scmp.ne.s32.totalorder %s3263_s18, %s3259_s17  ;;  %p3974_p1 = scmp.eq.s32.totalorder %s3375_s21, 0 }
  0x15   : > { %p302_p3 = scmp.eq.s32.totalorder %s2595_s22, 1  ;;  %p2596_p5 = scmp.ge.s32.totalorder %s3271_s20, 1 }
  0x16   : > { %p3384_p4 = por %p3974_p1, %p52_p0  ;;  %p309_p7 = scmp.lt.s32.totalorder %s3271_s20, 3 }
  0x17   : > { %p3389_p6 = por %p302_p3, %p52_p0  ;;  %s3273_s26 = smov [#allocation8]  }
  0x18   : > { %s4010_s23 = scalar_select %p3384_p4, 1, 0 }
  0x19   : > { %s4011_s24 = scalar_select %p3389_p6, 1, 0 }
  0x1a   : > { %p3394_p8 = pnand %p2596_p5, %p309_p7  ;;  %s321_s27 = sshll.u32 %s3273_s26, 4  ;;  %s3398_s27 = int_to_ptr.vmem [resolvable:$true] %s321_s27 }
  0x1b   : > { %4012 = sst [smem:[#allocation22_spill]] %s4011_s24  ;;  %s3274_s29 = smov [#allocation11]  }
  0x1c   : > { %s4013_s25 = scalar_select %p3394_p8, 1, 0 }
  0x1d   : > { %p2889_p9 = pneg %p3394_p8  ;;  %s353_s30 = sshll.u32 %s3274_s29, 4  ;;  %s3409_s30 = int_to_ptr.vmem [resolvable:$true] %s353_s30 }
  0x1e   : > { %s4015_s3 = sld [smem:[#allocation27_spill]] }
  0x1f   : > { %p3405_p11 = pnand %p2889_p9, %p3974_p1 }
  0x21   : > { %s4014_s28 = scalar_select %p3405_p11, 1, 0 }
  0x22   : > { %p3419_p13 = pneg %p3405_p11 }
  0x24   : > { %s2991_s14 = scalar_lea.hbm %s4015_s3, 512 }
  0x25   : > { %p2992_p12 = scmp.ne.s32.totalorder %s4015_s3, %s2991_s14  ;;  %p2998_p5 = scmp.lt.u32.totalorder %s2991_s14, %s4015_s3 }
  0x26   : > { %s4016_s22 = scalar_select %p3419_p13, 1, 0 }
  0x27   : > { %p2994_p0 = pnand %p3419_p13, %p2992_p12 }
  0x29   : > { %p2995_p3 = pneg %p2994_p0 }
  0x2b   : > { %p3000_p7 = pnand %p2998_p5, %p2995_p3 }
  0x2d   : > { %3003 = shalt.err (!%p3000_p7)
}
  0x2e   : > { %s3004_s12 = scalar_lea.vmem %s3398_s27, 512  ;;  %p3012_p2 = scmp.lt.s32.totalorder %s3398_s27, %s3398_s27 }
  0x2f   : > { %p3005_p9 = scmp.ne.s32.totalorder %s3398_s27, %s3004_s12  ;;  %p3013_p6 = scmp.lt.s32.totalorder %s3004_s12, %s3004_s12 }
  0x31   : > { %p3007_p10 = pnand %p3005_p9, %p3419_p13  ;;  %p3014_p12 = por %p3013_p6, %p3012_p2 }
  0x33   : > { %p3008_p1 = pneg %p3007_p10 }
  0x35   : > { %p3015_p0 = pnand %p3014_p12, %p3008_p1 }
  0x37   : > { %3018 = shalt.err (!%p3015_p0)
}
  0x38   : > { %s3978_s13 = smov 128   ;;  %s3980_s14 = smov 8  }
  0x39   : > { %2892 = dma.hbm_to_vmem [thread:$0]  (!%p3405_p11), %s4015_s3, 512, %s3398_s27, [#allocation9], %s3978_s13, %s3978_s13, %s3980_s14  }
  0x3a   : > { %s4017_s7 = sld [smem:[#allocation30_spill]] }
  0x40   : > { %s3019_s12 = scalar_lea.hbm %s4017_s7, 512 }
  0x41   : > { %p3020_p1 = scmp.ne.s32.totalorder %s4017_s7, %s3019_s12  ;;  %p3026_p10 = scmp.lt.u32.totalorder %s3019_s12, %s4017_s7 }
  0x43   : > { %p3022_p2 = pnand %p3020_p1, %p3419_p13 }
  0x45   : > { %p3023_p6 = pneg %p3022_p2 }
  0x47   : > { %p3028_p3 = pnand %p3026_p10, %p3023_p6 }
  0x49   : > { %3031 = shalt.err (!%p3028_p3)
}
  0x4a   : > { %s3032_s27 = scalar_lea.vmem %s3409_s30, 512  ;;  %p3040_p12 = scmp.lt.s32.totalorder %s3409_s30, %s3409_s30 }
  0x4b   : > { %p3033_p5 = scmp.ne.s32.totalorder %s3409_s30, %s3032_s27  ;;  %p3041_p0 = scmp.lt.s32.totalorder %s3032_s27, %s3032_s27 }
  0x4d   : > { %p3035_p7 = pnand %p3033_p5, %p3419_p13  ;;  %p3042_p1 = por %p3041_p0, %p3040_p12 }
  0x4f   : > { %p3036_p9 = pneg %p3035_p7 }
  0x51   : > { %p3043_p2 = pnand %p3042_p1, %p3036_p9 }
  0x53   : > { %3046 = shalt.err (!%p3043_p2)
}
  0x54   : > { %2898 = dma.hbm_to_vmem [thread:$0]  (!%p3405_p11), %s4017_s7, 512, %s3409_s30, [#allocation12], %s3978_s13, %s3978_s13, %s3980_s14  }
  0x55   : > { %s3470_s17 = sadd.s32 1, %s3271_s20   ;;  %s39_s24 = sadd.s32 1, %s3267_s19 }
  0x56   : > { %4018 = sst [smem:[#allocation23_spill]] %s3470_s17  ;;  %s36_s15 = ssub.s32 %s3271_s20, %s3470_s17 }
  0x57   : > { %p46_p6 = scmp.ne.s32.totalorder %s3267_s19, %s3263_s18  ;;  %p37_p10 = scmp.eq.s32.totalorder %s36_s15, 0 }
  0x58   : > { %p47_p3 = scmp.eq.s32.totalorder %s3271_s20, 0  ;;  %p4019_p5 = scmp.eq.s32.totalorder %s3375_s21, 1 }
  0x59   : > { %p2920_p9 = scmp.lt.s32.totalorder %s3271_s20, 2  ;;  %s3489_s29 = sand.u32 1, %s3267_s19  }
  0x5a   : > { %p3480_p7 = por %p4019_p5, %p46_p6  ;;  %p48_p12 = por %p47_p3, %p46_p6 }
  0x5b   : > { %s3486_s26 = scalar_select %p37_p10, %s3267_s19, %s39_s24  }
  0x5c   : > { %s4020_s16 = scalar_select %p3480_p7, 1, 0 }
  0x5d   : > { %4022 = sst [smem:[#allocation25_spill]] %s3486_s26  ;;  %s402_s30 = sand.u32 1, %s3271_s20  }
  0x5e   : > { %4021 = sst [smem:[#allocation24_spill]] %s4020_s16  ;;  %s3985_s12 = sshll.u32 %s3489_s29, 4 }
  0x5f   : > { %p3493_p0 = pnand %p2920_p9, %p48_p12  ;;  %s2661_s10 = sshll.u32 %s3271_s20, 8 }
  0x60   : > { %s4024_s1 = sld [smem:[#allocation26_spill]]  ;;  %s406_s24 = scalar_lea.vmem [#allocation5], %s3985_s12 }
  0x61   : > { %s4023_s27 = scalar_select %p3493_p0, 1, 0 }
  0x62   : > { %s413_s14 = sshll.u32 %s406_s24, 4  ;;  %s3510_s26 = scalar_lea.hbm %s3964_s2, %s2661_s10  ;;  %s3505_s14 = int_to_ptr.vmem [resolvable:$true] %s413_s14 }
  0x63   : > { %s3512_s19 = scalar_lea.sflag [#allocation6], %s402_s30  ;;  %p3518_p2 = pneg %p3493_p0 }
  0x65   : > { %s4025_s11 = scalar_select %p3518_p2, 1, 0 }
  0x66   : > { %s3501_s13 = scalar_lea.hbm %s4024_s1, %s2661_s10  ;;  %s3052_s12 = scalar_lea.hbm %s4024_s1, 512 }
  0x67   : > { %s3047_s17 = scalar_lea.hbm %s3501_s13, 256  ;;  %p3053_p3 = scmp.lt.u32.totalorder %s3501_s13, %s4024_s1 }
  0x68   : > { %p3048_p1 = scmp.ne.s32.totalorder %s3501_s13, %s3047_s17  ;;  %p3054_p5 = scmp.lt.u32.totalorder %s3052_s12, %s3047_s17 }
  0x69   : > { %p3056_p12 = scmp.lt.u32.totalorder %s3047_s17, %s3501_s13 }
  0x6a   : > { %p3050_p6 = pnand %p3518_p2, %p3048_p1  ;;  %p3055_p9 = por %p3054_p5, %p3053_p3 }
  0x6c   : > { %p3051_p10 = pneg %p3050_p6  ;;  %p3057_p7 = por %p3056_p12, %p3055_p9 }
  0x6e   : > { %p3058_p4 = pnand %p3057_p7, %p3051_p10 }
  0x70   : > { %3061 = shalt.err (!%p3058_p4)
}
  0x71   : > { %s3062_s30 = scalar_lea.vmem %s3505_s14, 256  ;;  %s3277_s10 = smov [#allocation5]  }
  0x72   : > { %p3063_p1 = scmp.ne.s32.totalorder %s3505_s14, %s3062_s30  ;;  %s3067_s15 = sshll.u32 %s3277_s10, 4  ;;  %s3068_s15 = int_to_ptr.vmem [resolvable:$false] %s3067_s15 }
  0x73   : > { %s3069_s24 = scalar_lea.vmem %s3068_s15, 512  ;;  %p3070_p11 = scmp.lt.s32.totalorder %s3505_s14, %s3068_s15 }
  0x74   : > { %p3065_p6 = pnand %p3063_p1, %p3518_p2  ;;  %p3071_p13 = scmp.lt.s32.totalorder %s3069_s24, %s3062_s30 }
  0x76   : > { %p3066_p8 = pneg %p3065_p6  ;;  %p3072_p3 = por %p3071_p13, %p3070_p11 }
  0x78   : > { %p3073_p5 = pnand %p3072_p3, %p3066_p8 }
  0x7a   : > { %3076 = shalt.err (!%p3073_p5)
}
  0x7b   : > { %s4026_s17 = smov 8   ;;  %s4027_s12 = smov 128  }
  0x7c   : > { %2908 = dma.hbm_to_vmem [thread:$0]  (!%p3493_p0), %s3501_s13, 256, %s3505_s14, %s3512_s19, %s4027_s12, %s4027_s12, %s4026_s17  }
  0x7d   : > { %s4028_s3 = sshll.u32 %s3489_s29, 4  ;;  %s3278_s30 = smov [#allocation10]  }
  0x7e   : > { %s427_s7 = scalar_lea.vmem [#allocation7], %s4028_s3  ;;  %s337_s15 = sshll.u32 %s3278_s30, 4  ;;  %s338_s15 = int_to_ptr.vmem [resolvable:$true] %s337_s15 }
  0x7f   : > { %s434_s10 = sshll.u32 %s427_s7, 4  ;;  %s3077_s16 = scalar_lea.hbm %s3967_s5, 512  ;;  %s3547_s10 = int_to_ptr.vmem [resolvable:$true] %s434_s10 }
  0x80   : > { %p3078_p4 = scmp.ne.s32.totalorder %s3967_s5, %s3077_s16  ;;  %p4029_p8 = scmp.ne.s32.totalorder %s4016_s22, 0 }
  0x81   : > { %p3084_p7 = scmp.lt.u32.totalorder %s3077_s16, %s3967_s5 }
  0x82   : > { %p3080_p11 = pnand %p3078_p4, %p4029_p8 }
  0x84   : > { %p3081_p13 = pneg %p3080_p11 }
  0x86   : > { %p3086_p10 = pnand %p3084_p7, %p3081_p13 }
  0x88   : > { %3089 = shalt.err (!%p3086_p10)
}
  0x89   : > { %s3090_s3 = scalar_lea.vmem %s338_s15, 512  ;;  %p3098_p6 = scmp.lt.s32.totalorder %s338_s15, %s338_s15 }
  0x8a   : > { %p3091_p9 = scmp.ne.s32.totalorder %s338_s15, %s3090_s3  ;;  %p3099_p3 = scmp.lt.s32.totalorder %s3090_s3, %s3090_s3 }
  0x8c   : > { %p3093_p12 = pnand %p3091_p9, %p4029_p8  ;;  %p3100_p5 = por %p3099_p3, %p3098_p6 }
  0x8e   : > { %p3094_p1 = pneg %p3093_p12 }
  0x90   : > { %p3101_p0 = pnand %p3100_p5, %p3094_p1 }
  0x92   : > { %3104 = shalt.err (!%p3101_p0)
}
  0x93   : > { %p4030_p4 = scmp.ne.s32.totalorder %s4014_s28, 0  ;;  %s3279_s9 = smov [#allocation13]  }
  0x94   : > { %s367_s16 = sshll.u32 %s3279_s9, 4  ;;  %s2602_s7 = sshll.u32 %s3489_s29, 3  ;;  %s368_s16 = int_to_ptr.vmem [resolvable:$true] %s367_s16 }
  0x95   : > { %2895 = dma.hbm_to_vmem [thread:$0]  (!%p4030_p4), %s3967_s5, 512, %s338_s15, [#allocation9], %s4027_s12, %s4027_s12, %s4026_s17  }
  0x96   : > { %s3105_s13 = scalar_lea.hbm %s3970_s8, 16 }
  0x97   : > { %p3106_p0 = scmp.ne.s32.totalorder %s3970_s8, %s3105_s13  ;;  %p3112_p7 = scmp.lt.u32.totalorder %s3105_s13, %s3970_s8 }
  0x99   : > { %p3108_p11 = pnand %p3106_p0, %p4029_p8 }
  0x9b   : > { %p3109_p13 = pneg %p3108_p11 }
  0x9d   : > { %p3114_p10 = pnand %p3112_p7, %p3109_p13 }
  0x9f   : > { %3117 = shalt.err (!%p3114_p10)
}
  0xa0   : > { %s3118_s15 = scalar_lea.vmem %s368_s16, 16  ;;  %s3125_s4 = scalar_lea.vmem %s368_s16, 32 }
  0xa1   : > { %p3119_p9 = scmp.ne.s32.totalorder %s368_s16, %s3118_s15  ;;  %p3126_p6 = scmp.lt.s32.totalorder %s368_s16, %s368_s16 }
  0xa2   : > { %p3127_p3 = scmp.lt.s32.totalorder %s3125_s4, %s3118_s15 }
  0xa3   : > { %p3121_p12 = pnand %p3119_p9, %p4029_p8 }
  0xa4   : > { %p3128_p5 = por %p3127_p3, %p3126_p6 }
  0xa5   : > { %p3122_p1 = pneg %p3121_p12 }
  0xa7   : > { %p3129_p2 = pnand %p3128_p5, %p3122_p1 }
  0xa9   : > { %3132 = shalt.err (!%p3129_p2)
}
  0xaa   : > { %2901 = dma.hbm_to_vmem [thread:$0]  (!%p4030_p4), %s3970_s8, 16, %s368_s16, [#allocation12]  }
  0xab   : > { %s2603_s6 = sshll.u32 %s3271_s20, 7  ;;  %s388_s14 = scalar_lea.vmem [#allocation2], %s2602_s7 }
  0xac   : > { %s3593_s13 = scalar_lea.hbm %s3962_s0, %s2603_s6  ;;  %s395_s3 = sshll.u32 %s388_s14, 4  ;;  %s396_s3 = int_to_ptr.vmem [resolvable:$true] %s395_s3 }
  0xad   : > { %s385_s28 = scalar_lea.sflag [#allocation3], %s3489_s29  ;;  %s3133_s1 = scalar_lea.hbm %s3593_s13, 128 }
  0xae   : > { %p3134_p2 = scmp.ne.s32.totalorder %s3593_s13, %s3133_s1  ;;  %p4031_p8 = scmp.ne.s32.totalorder %s4025_s11, 0 }
  0xaf   : > { %s3138_s4 = scalar_lea.hbm %s3962_s0, 256  ;;  %p3139_p4 = scmp.lt.u32.totalorder %s3593_s13, %s3962_s0 }
  0xb0   : > { %p3136_p0 = pnand %p3134_p2, %p4031_p8  ;;  %p3140_p13 = scmp.lt.u32.totalorder %s3138_s4, %s3133_s1 }
  0xb1   : > { %p3142_p10 = scmp.lt.u32.totalorder %s3133_s1, %s3593_s13 }
  0xb2   : > { %p3137_p11 = pneg %p3136_p0  ;;  %p3141_p7 = por %p3140_p13, %p3139_p4 }
  0xb4   : > { %p3143_p9 = por %p3142_p10, %p3141_p7 }
  0xb6   : > { %p3144_p12 = pnand %p3143_p9, %p3137_p11 }
  0xb8   : > { %3147 = shalt.err (!%p3144_p12)
}
  0xb9   : > { %s3148_s29 = scalar_lea.vmem %s396_s3, 128  ;;  %s3280_s7 = smov [#allocation2]  }
  0xba   : > { %p3149_p1 = scmp.ne.s32.totalorder %s396_s3, %s3148_s29  ;;  %s3153_s6 = sshll.u32 %s3280_s7, 4  ;;  %s3154_s6 = int_to_ptr.vmem [resolvable:$false] %s3153_s6 }
  0xbb   : > { %s3155_s24 = scalar_lea.vmem %s3154_s6, 256  ;;  %p3156_p5 = scmp.lt.s32.totalorder %s396_s3, %s3154_s6 }
  0xbc   : > { %p3151_p6 = pnand %p3149_p1, %p4031_p8  ;;  %p3157_p2 = scmp.lt.s32.totalorder %s3155_s24, %s3148_s29 }
  0xbe   : > { %p3152_p3 = pneg %p3151_p6  ;;  %p3158_p0 = por %p3157_p2, %p3156_p5 }
  0xc0   : > { %p3159_p4 = pnand %p3158_p0, %p3152_p3 }
  0xc2   : > { %3162 = shalt.err (!%p3159_p4)
}
  0xc3   : > { %p4032_p13 = scmp.ne.s32.totalorder %s4023_s27, 0  ;;  %s3163_s22 = scalar_lea.hbm %s3510_s26, 256 }
  0xc4   : > { %p3164_p11 = scmp.ne.s32.totalorder %s3510_s26, %s3163_s22  ;;  %s3168_s16 = scalar_lea.hbm %s3964_s2, 512 }
  0xc5   : > { %2905 = dma.hbm_to_vmem [thread:$0]  (!%p4032_p13), %s3593_s13, 128, %s396_s3, %s385_s28  }
  0xc6   : > { %p3166_p7 = pnand %p3164_p11, %p4031_p8  ;;  %p3169_p9 = scmp.lt.u32.totalorder %s3510_s26, %s3964_s2 }
  0xc7   : > { %p3170_p12 = scmp.lt.u32.totalorder %s3168_s16, %s3163_s22  ;;  %p3172_p6 = scmp.lt.u32.totalorder %s3163_s22, %s3510_s26 }
  0xc8   : > { %p3167_p10 = pneg %p3166_p7 }
  0xc9   : > { %p3171_p1 = por %p3170_p12, %p3169_p9 }
  0xcb   : > { %p3173_p3 = por %p3172_p6, %p3171_p1 }
  0xcd   : > { %p3174_p5 = pnand %p3173_p3, %p3167_p10 }
  0xcf   : > { %3177 = shalt.err (!%p3174_p5)
}
  0xd0   : > { %s3178_s13 = scalar_lea.vmem %s3547_s10, 256  ;;  %s3281_s3 = smov [#allocation7]  }
  0xd1   : > { %p3179_p2 = scmp.ne.s32.totalorder %s3547_s10, %s3178_s13  ;;  %s3183_s28 = sshll.u32 %s3281_s3, 4  ;;  %s3184_s28 = int_to_ptr.vmem [resolvable:$false] %s3183_s28 }
  0xd2   : > { %s3185_s9 = scalar_lea.vmem %s3184_s28, 512  ;;  %p3186_p11 = scmp.lt.s32.totalorder %s3547_s10, %s3184_s28 }
  0xd3   : > { %p3181_p0 = pnand %p3179_p2, %p4031_p8  ;;  %p3187_p7 = scmp.lt.s32.totalorder %s3185_s9, %s3178_s13 }
  0xd5   : > { %p3182_p4 = pneg %p3181_p0  ;;  %p3188_p9 = por %p3187_p7, %p3186_p11 }
  0xd7   : > { %p3189_p12 = pnand %p3188_p9, %p3182_p4 }
  0xd9   : > { %3192 = shalt.err (!%p3189_p12)
}
  0xda   : > { %2911 = dma.hbm_to_vmem [thread:$0]  (!%p4032_p13), %s3510_s26, 256, %s3547_s10, %s3512_s19, %s4027_s12, %s4027_s12, %s4026_s17  }
  0xdb   : > { %p4033_p8 = scmp.ne.s32.totalorder %s4013_s25, 0 }
  0xdc   : > { %s3641_s11 = sand.u32 (!%p4033_p8), 1, %s3263_s18   ;;  %p4034_p10 = scmp.ne.s32.totalorder (!%p4033_p8), %s4010_s23, 0 }
  0xdd   : > { %446 = sbr.rel (%p4033_p8) target bundleno = 1736 (0x6c8), region = 64  ;;  %s2611_s30 = sshll.u32 (!%p4033_p8), %s3641_s11, 3 }
  0xde   : > { %s449_s29 = scalar_lea.sflag (!%p4033_p8), [#allocation3], %s3641_s11  ;;  %s3647_s27 = scalar_lea.vmem (!%p4033_p8), [#allocation2], %s2611_s30 }
  0xe4   : > { %3238 = dma.done.wait (%p4034_p10), %s449_s29, 128  }
  0xe5   : > { %3240 = vsyncadd (%p4034_p10), %s449_s29, 4294967168  ;;  %s457_s19 = sand.u32 1, %s3375_s21   ;;  %s2612_s25 = sshll.u32 %s3641_s11, 4 }
  0xe6   : > { %s458_s26 = scalar_lea.sflag [#allocation6], %s457_s19  ;;  %s3655_s17 = scalar_lea.vmem [#allocation5], %s2612_s25 }
  0xe7   : > { %3242 = dma.done.wait (%p4034_p10), %s458_s26, 512  }
  0xe8   : > { %3244 = vsyncadd (%p4034_p10), %s458_s26, 4294966784  ;;  %s3661_s12 = scalar_lea.vmem [#allocation7], %s2612_s25  ;;  %p4035_p13 = scmp.eq.s32.totalorder %s3375_s21, 0 }
  0xea   : > { %3246 = dma.done.wait (%p4035_p13), [#allocation9], 1024   ;;  %p4036_p1 = pmov %p4035_p13 }
  0xec   : > { %3248 = vsyncadd (%p4036_p1), [#allocation9], 4294966272  ;;  %p4037_p6 = pmov %p4036_p1 }
  0xed   : > { %p4038_p3 = pmov %p4036_p1 }
  0xee   : > { %3250 = dma.done.wait (%p4037_p6), [#allocation12], 528  }
  0xef   : > { %3252 = vsyncadd (%p4038_p3), [#allocation12], 4294966768  ;;  %v3282_v0 = vmov 0.0|0.0   ;;  %vm3283_vm0 = vmmov 0   ;;  %v3284_v1 = vmov 0.0   ;;  %vm551_vm1 = vcmask 261120  }
  0xf0   : > { %2809 = vmatprep.subr.bf16.mxu0 %v3282_v0  ;;  %2717 = vmatprep.mubr.msk.f32.mxu0 %vm3283_vm0, %v3284_v1  ;;  %v625_v2 = vld [vmem:[#allocation10] sm:$0xff]  ;;  %v626_v3 = vld [vmem:[#allocation10 + $0x8] sm:$0xff]  ;;  %v627_v4 = vld [vmem:[#allocation10 + $0x10] sm:$0xff]  ;;  %s4039_s7 = sld [smem:[#allocation29_spill]]  ;;  %s3285_s6 = smov 112   ;;  %v824_v36 = vlaneseq  ;;  %vm1539_vm2 = vcmask 64512  }
  0xf1   : > { %v2815_v5 = vpack.c.bf16 %v626_v3, %v625_v2  ;;  %v628_v6 = vld [vmem:[#allocation10 + $0x18] sm:$0xff]  ;;  %v536_v7 = vld [vmem:[%s3655_s17] sm:$0xff]  ;;  %v541_v10 = vld [vmem:[#allocation8 + $0x8] sm:$0xff]  ;;  %s3286_s24 = smov 120   ;;  %s4040_s1 = sld [smem:[#allocation28_spill]]  ;;  %vm1856_vm4 = vcmask 130048  }
  0xf2   : > { %v2819_v8 = vpack.c.bf16 %v628_v6, %v627_v4  ;;  %2728 = vmatprep.mubr.msk.f32.mxu1 %vm551_vm1, %v536_v7  ;;  %v540_v9 = vld [vmem:[#allocation8] sm:$0xff]  ;;  %v542_v11 = vld [vmem:[#allocation8 + $0x10] sm:$0xff]  ;;  %v543_v13 = vld [vmem:[#allocation8 + $0x18] sm:$0xff]  ;;  %s3287_s16 = smov 104   ;;  %v3288_v34 = vmov 1983009808  }
  0xf3   : > { %2816 = vmatprep.subr.bf16.mxu1 %v2815_v5  ;;  %v2810_v12 = vpack.c.bf16 %v541_v10, %v540_v9  ;;  %v2813_v14 = vpack.c.bf16 %v543_v13, %v542_v11  ;;  %v537_v15 = vld [vmem:[%s3655_s17 + $0x8] sm:$0xff]  ;;  %v717_v26 = vld [vmem:[#allocation11] sm:$0xff]  ;;  %v719_v29 = vld [vmem:[#allocation11 + $0x10] sm:$0xff]  ;;  %v822_v35 = vunpack.c.l.s4 %v3288_v34  ;;  %v825_v40 = vshrl.u32 %v824_v36, 7  ;;  %s4043_s13 = sld [smem:[#allocation31_spill]]  ;;  %s3290_s25 = smov 16  }
  0xf4   : > { %2818 = vmatpush3.bf16.msra.mxu1 %v2815_v5  ;;  %v535_v16 = vld [vmem:[%s3647_s27] sm:$0xff]  ;;  %v718_v27 = vld [vmem:[#allocation11 + $0x8] sm:$0xff]  ;;  %v538_v32 = vld [vmem:[%s3661_s12] sm:$0xff]  ;;  %v3289_v41 = vmov 1934713408   ;;  %s3291_s26 = smov 8  }
  0xf5   : > { %2820 = vmatprep.subr.bf16.mxu1 %v2819_v8  ;;  %2811 = vmatpush3.bf16.msra.mxu0 %v2810_v12  ;;  %v2823_v28 = vpack.c.bf16 %v718_v27, %v717_v26  ;;  %v720_v30 = vld [vmem:[#allocation11 + $0x18] sm:$0xff]  ;;  %v823_v39 = vunpack.c.0.s8 %v822_v35  ;;  %v854_v42 = vunpack.c.l.s4 %v3289_v41  ;;  %vm3751_vm3 = vmpackc.low %vm1539_vm2, %vm1539_vm2  ;;  %s3292_s17 = smov 24   ;;  %vm2343_vm5 = vcmask 195584   ;;  %s2431_s4 = scalar_lea.sflag [#allocation4], %s3641_s11 }
  0xf6   : > { %2812 = vmatprep.subr.bf16.mxu0 %v3282_v0  ;;  %v2621_v17 = vld [vmem:[%s4039_s7] ss:$0 sm:$0xff]  ;;  %v2827_v31 = vpack.c.bf16 %v720_v30, %v719_v29  ;;  %v539_v33 = vld [vmem:[%s3661_s12 + $0x8] sm:$0xff]  ;;  %s4044_s12 = sld [smem:[#allocation24_spill]]  ;;  %s4045_s7 = sld [smem:[#allocation32_spill]] }
  0xf7   : > { %v2619_v24 = vld [vmem:[%s4040_s1] ss:$0 sm:$0xff]  ;;  %v3711_v45 = vsub.s32 %v823_v39, %v825_v40  ;;  %v855_v48 = vunpack.c.0.s8 %v854_v42 }
  0xf8   : > { %2822 = vmatpush3.bf16.msra.mxu1 %v2819_v8 }
  0xf9   : > { %2814 = vmatpush3.bf16.msra.mxu0 %v2813_v14  ;;  %2831 = vmatprep.subr.bf16.mxu1 %v3282_v0  ;;  %v3715_v59 = vsub.s32 %v855_v48, %v825_v40 }
  0xfa   : > { %2824 = vmatprep.subr.bf16.mxu0 %v2823_v28 }
  0xfb   : > { %2729 = vmatmul.mubr.msk.f32.vlgmr.msra.gmra.mrb[0].mxu1 %vm551_vm1, %v537_v15 }
  0xfc   : > { %2718 = vmatmul.mubr.msk.f32.vlgmr.msra.gmra.mrb[0].mxu0 %vm551_vm1, %v535_v16  ;;  %2746 = vmatprep.mubr.msk.f32.mxu1 %vm3283_vm0, %v3284_v1  ;;  %p4047_p2 = scmp.ne.s32.totalorder %s4044_s12, 0 }
  0xfd   : > { %2826 = vmatpush3.bf16.msra.mxu0 %v2823_v28  ;;  %2739 = vmatprep.mubr.msk.f32.mxu0 %vm551_vm1, %v538_v32 }
  0xfe   : > { %2828 = vmatprep.subr.bf16.mxu0 %v2827_v31 }
 0x101   : > { %2830 = vmatpush3.bf16.msra.mxu0 %v2827_v31 }
 0x102   : > { %2835 = vmatprep.subr.bf16.mxu0 %v3282_v0 }
 0x104   : > { %2740 = vmatmul.mubr.msk.f32.vlgmr.msra.gmra.mrb[2].mxu0 %vm551_vm1, %v539_v33 }
 0x105   : > { %2753 = vmatprep.mubr.msk.f32.mxu0 %vm3283_vm0, %v3284_v1 }
 0x1ce   : > { %v2730_v18 = vpop.f32.mrb[0].mxu1 }
 0x1cf   : > { %v714_v19 = vadd.f32 %v2730_v18, %v2621_v17  ;;  %v708_v20 = vpop.f32.mrb[1].mxu1  ;;  %v621_v21 = vpop.f32.mrb[0].mxu0 }
 0x1d0   : > { %v2719_v22 = vpop.f32.mrb[1].mxu0  ;;  %v709_v23 = vadd.f32 %v2621_v17, %v708_v20  ;;  %v3696_v25 = vadd.f32 %v2619_v24, %v621_v21 }
 0x1d1   : > { %965 = vrot.lane.b32.xlu1 %v714_v19, %s3285_s6  ;;  %959 = vrot.lane.b32.xlu0 %v714_v19, %s3286_s24 }
 0x1d5   : > { %963 = vrot.lane.b32.xlu1 %v709_v23, %s3285_s6  ;;  %957 = vrot.lane.b32.xlu0 %v709_v23, %s3286_s24 }
 0x1d9   : > { %971 = vrot.lane.b32.xlu1 %v714_v19, %s3287_s16  ;;  %969 = vrot.lane.b32.xlu0 %v709_v23, %s3287_s16 }
 0x1dd   : > { %813 = vrot.lane.b32.xlu1 %v3696_v25, %s3285_s6  ;;  %810 = vrot.lane.b32.xlu0 %v3696_v25, %s3286_s24 }
 0x1e1   : > { %816 = vrot.lane.b32.xlu0 %v3696_v25, %s3287_s16 }
 0x243   : > { %v966_v37 = vpop.permute.xlu1 %965  ;;  %v960_v38 = vpop.permute.xlu0 %959 }
 0x244   : > { %v1043_v46 = vcombine.low %v714_v19, %v966_v37  ;;  %v1044_v47 = vcombine.high %v714_v19, %v966_v37 }
 0x246   : > { %v1051_v57 = vrot.slane %v1043_v46, %v3711_v45  ;;  %v1058_v58 = vrot.slane %v1044_v47, %v3711_v45 }
 0x247   : > { %v964_v43 = vpop.permute.xlu1 %963  ;;  %v958_v44 = vpop.permute.xlu0 %957 }
 0x248   : > { %v975_v49 = vcombine.low %v709_v23, %v964_v43  ;;  %v976_v50 = vcombine.high %v709_v23, %v964_v43 }
 0x24a   : > { %v983_v2 = vrot.slane %v975_v49, %v3711_v45  ;;  %v990_v3 = vrot.slane %v976_v50, %v3711_v45 }
 0x24b   : > { %v972_v51 = vpop.permute.xlu1 %971  ;;  %v970_v52 = vpop.permute.xlu0 %969 }
 0x24c   : > { %v1059_v53 = vcombine.low %v960_v38, %v972_v51  ;;  %v1060_v54 = vcombine.high %v960_v38, %v972_v51  ;;  %v991_v55 = vcombine.low %v958_v44, %v970_v52  ;;  %v992_v56 = vcombine.high %v958_v44, %v970_v52 }
 0x24e   : > { %v1067_v60 = vrot.slane %v1059_v53, %v3711_v45  ;;  %v1074_v61 = vrot.slane %v1060_v54, %v3711_v45  ;;  %v999_v62 = vrot.slane %v991_v55, %v3711_v45  ;;  %v1006_v63 = vrot.slane %v992_v56, %v3711_v45 }
 0x24f   : > { %v811_v20 = vpop.permute.xlu0 %810  ;;  %v814_v42 = vpop.permute.xlu1 %813 }
 0x250   : > { %v1075_v4 = vcombine.low %v1051_v57, %v1067_v60  ;;  %v1076_v5 = vcombine.high %v1051_v57, %v1067_v60  ;;  %v1091_v6 = vcombine.low %v1058_v58, %v1074_v61  ;;  %v1092_v7 = vcombine.high %v1058_v58, %v1074_v61 }
 0x251   : > { %v1007_v8 = vcombine.low %v983_v2, %v999_v62  ;;  %v1008_v9 = vcombine.high %v983_v2, %v999_v62  ;;  %v1023_v10 = vcombine.low %v990_v3, %v1006_v63  ;;  %v1024_v11 = vcombine.high %v990_v3, %v1006_v63 }
 0x252   : > { %v1083_v12 = vrot.slane %v1075_v4, %v3715_v59  ;;  %v1090_v13 = vrot.slane %v1076_v5, %v3715_v59  ;;  %v1099_v14 = vrot.slane %v1091_v6, %v3715_v59  ;;  %v1106_v15 = vrot.slane %v1092_v7, %v3715_v59 }
 0x253   : > { %v1015_v16 = vrot.slane %v1007_v8, %v3715_v59  ;;  %v1022_v17 = vrot.slane %v1008_v9, %v3715_v59  ;;  %v1031_v18 = vrot.slane %v1023_v10, %v3715_v59  ;;  %v1038_v19 = vrot.slane %v1024_v11, %v3715_v59  ;;  %v817_v43 = vpop.permute.xlu0 %816 }
 0x254   : > { %v1179_v21 = vcombine.low %v1083_v12, %v1090_v13  ;;  %v2631_v22 = vcombine.high %v1083_v12, %v1090_v13  ;;  %v1195_v23 = vcombine.low %v1099_v14, %v1106_v15  ;;  %v2632_v24 = vcombine.high %v1099_v14, %v1106_v15 }
 0x255   : > { %v1111_v26 = vcombine.low %v1015_v16, %v1022_v17  ;;  %v2629_v27 = vcombine.high %v1015_v16, %v1022_v17  ;;  %v1127_v28 = vcombine.low %v1031_v18, %v1038_v19  ;;  %v2630_v29 = vcombine.high %v1031_v18, %v1038_v19 }
 0x256   : > { %v1186_v30 = vrot.slane %v1179_v21, %v3711_v45  ;;  %v1194_v31 = vrot.slane %v2631_v22, %v3711_v45  ;;  %v1202_v32 = vrot.slane %v1195_v23, %v3711_v45  ;;  %v1210_v33 = vrot.slane %v2632_v24, %v3711_v45 }
 0x257   : > { %v1118_v34 = vrot.slane %v1111_v26, %v3711_v45  ;;  %v1126_v35 = vrot.slane %v2629_v27, %v3711_v45  ;;  %v1134_v36 = vrot.slane %v1127_v28, %v3711_v45  ;;  %v1142_v37 = vrot.slane %v2630_v29, %v3711_v45 }
 0x258   : > { %v1211_v38 = vcombine.low %v1186_v30, %v1194_v31  ;;  %v1227_v39 = vcombine.low %v1202_v32, %v1210_v33  ;;  %v819_v49 = vcombine.low %v3696_v25, %v814_v42  ;;  %v820_v50 = vcombine.high %v3696_v25, %v814_v42 }
 0x259   : > { %v1143_v40 = vcombine.low %v1118_v34, %v1126_v35  ;;  %v1159_v41 = vcombine.low %v1134_v36, %v1142_v37  ;;  %v835_v51 = vcombine.low %v811_v20, %v817_v43  ;;  %v836_v52 = vcombine.high %v811_v20, %v817_v43 }
 0x25a   : > { %v1219_v44 = vrot.slane %v1211_v38, %v3715_v59  ;;  %v1235_v46 = vrot.slane %v1227_v39, %v3715_v59  ;;  %v827_v57 = vrot.slane %v819_v49, %v3711_v45  ;;  %v834_v58 = vrot.slane %v820_v50, %v3711_v45 }
 0x25b   : > { %v1151_v47 = vrot.slane %v1143_v40, %v3715_v59  ;;  %v1167_v48 = vrot.slane %v1159_v41, %v3715_v59  ;;  %v843_v60 = vrot.slane %v835_v51, %v3711_v45  ;;  %v850_v61 = vrot.slane %v836_v52, %v3711_v45 }
 0x25c   : > { %v1243_v54 = vcombine.low %v1219_v44, %v1235_v46  ;;  %v1244_v56 = vcombine.high %v1219_v44, %v1235_v46  ;;  %v1212_v25 = vcombine.high %v1186_v30, %v1194_v31  ;;  %v1228_v7 = vcombine.high %v1202_v32, %v1210_v33  ;;  %v2741_v46 = vpop.f32.mrb[2].mxu0 }
 0x25d   : > { %v1175_v53 = vcombine.low %v1151_v47, %v1167_v48  ;;  %v1176_v55 = vcombine.high %v1151_v47, %v1167_v48  ;;  %v851_v3 = vcombine.low %v827_v57, %v843_v60  ;;  %v852_v4 = vcombine.high %v827_v57, %v843_v60  ;;  %v800_v47 = vpop.f32.mrb[3].mxu0 }
 0x25e   : > { %v867_v5 = vcombine.low %v834_v58, %v850_v61  ;;  %v868_v6 = vcombine.high %v834_v58, %v850_v61  ;;  %v1144_v8 = vcombine.high %v1118_v34, %v1126_v35  ;;  %v1160_v9 = vcombine.high %v1134_v36, %v1142_v37  ;;  %v2624_v61 = vld [vmem:[#allocation13] ss:$0 sm:$0xff] }
 0x25f   : > { %v2832_v63 = vpack.c.bf16 %v1243_v54, %v1175_v53  ;;  %v2836_v2 = vpack.c.bf16 %v1244_v56, %v1176_v55  ;;  %v859_v10 = vrot.slane %v851_v3, %v3715_v59  ;;  %v866_v11 = vrot.slane %v852_v4, %v3715_v59 }
 0x260   : > { %v875_v12 = vrot.slane %v867_v5, %v3715_v59  ;;  %v882_v13 = vrot.slane %v868_v6, %v3715_v59  ;;  %v1226_v18 = vrot.slane %v1212_v25, %v3715_v59  ;;  %v1242_v19 = vrot.slane %v1228_v7, %v3715_v59 }
 0x261   : > { %2834 = vmatpush3.bf16.xpose.msk.msra.mxu1 %vm3751_vm3, %v2832_v63  ;;  %2838 = vmatpush3.bf16.xpose.msk.msra.mxu0 %vm3751_vm3, %v2836_v2  ;;  %v887_v14 = vcombine.low %v859_v10, %v866_v11  ;;  %v2627_v15 = vcombine.high %v859_v10, %v866_v11  ;;  %v1158_v20 = vrot.slane %v1144_v8, %v3715_v59 }
 0x262   : > { %2839 = vmatprep.subr.bf16.mxu1 %v3282_v0  ;;  %2843 = vmatprep.subr.bf16.mxu0 %v3282_v0  ;;  %v903_v16 = vcombine.low %v875_v12, %v882_v13  ;;  %v2628_v17 = vcombine.high %v875_v12, %v882_v13  ;;  %v1174_v21 = vrot.slane %v1160_v9, %v3715_v59 }
 0x263   : > { %v894_v22 = vrot.slane %v887_v14, %v3711_v45  ;;  %v902_v23 = vrot.slane %v2627_v15, %v3711_v45  ;;  %v1245_v30 = vcombine.low %v1226_v18, %v1242_v19  ;;  %v1246_v32 = vcombine.high %v1226_v18, %v1242_v19 }
 0x264   : > { %v910_v24 = vrot.slane %v903_v16, %v3711_v45  ;;  %v918_v26 = vrot.slane %v2628_v17, %v3711_v45  ;;  %v1177_v29 = vcombine.low %v1158_v20, %v1174_v21  ;;  %v1178_v31 = vcombine.high %v1158_v20, %v1174_v21 }
 0x265   : > { %v919_v27 = vcombine.low %v894_v22, %v902_v23  ;;  %v920_v35 = vcombine.high %v894_v22, %v902_v23  ;;  %v801_v62 = vadd.f32 %v2624_v61, %v800_v47  ;;  %v3800_v25 = vadd.f32 %v2741_v46, %v2624_v61 }
 0x266   : > { %v935_v28 = vcombine.low %v910_v24, %v918_v26  ;;  %v936_v36 = vcombine.high %v910_v24, %v918_v26  ;;  %v2840_v39 = vpack.c.bf16 %v1245_v30, %v1177_v29  ;;  %v2844_v40 = vpack.c.bf16 %v1246_v32, %v1178_v31 }
 0x267   : > { %v927_v33 = vrot.slane %v919_v27, %v3715_v59  ;;  %v934_v41 = vrot.slane %v920_v35, %v3715_v59 }
 0x268   : > { %v943_v34 = vrot.slane %v935_v28, %v3715_v59  ;;  %v950_v42 = vrot.slane %v936_v36, %v3715_v59 }
 0x26a   : > { %v951_v37 = vcombine.low %v927_v33, %v943_v34  ;;  %v952_v38 = vcombine.high %v927_v33, %v943_v34  ;;  %v953_v43 = vcombine.low %v934_v41, %v950_v42  ;;  %v954_v44 = vcombine.high %v934_v41, %v950_v42 }
 0x26c   : > { %2747 = vmatmul.mubr.msk.f32.vlgmr.msra.gmra.mrb[2].mxu1 %vm1539_vm2, %v951_v37  ;;  %2754 = vmatmul.mubr.msk.f32.vlgmr.msra.gmra.mrb[4].mxu0 %vm1539_vm2, %v952_v38 }
 0x26d   : > { %2842 = vmatpush3.bf16.xpose.msk.msra.mxu1 %vm3751_vm3, %v2840_v39  ;;  %2846 = vmatpush3.bf16.xpose.msk.msra.mxu0 %vm3751_vm3, %v2844_v40 }
 0x26e   : > { %2760 = vmatprep.mubr.msk.f32.mxu1 %vm3283_vm0, %v3284_v1  ;;  %2767 = vmatprep.mubr.msk.f32.mxu0 %vm3283_vm0, %v3284_v1 }
 0x26f   : > { %2847 = vmatprep.subr.bf16.mxu1 %v3282_v0  ;;  %2859 = vmatprep.subr.bf16.mxu0 %v3282_v0 }
 0x274   : > { %2761 = vmatmul.mubr.msk.f32.vlgmr.msra.gmra.mrb[4].mxu1 %vm1539_vm2, %v953_v43  ;;  %2768 = vmatmul.mubr.msk.f32.vlgmr.msra.gmra.mrb[6].mxu0 %vm1539_vm2, %v954_v44 }
 0x275   : > { %2774 = vmatprep.mubr.msk.f32.mxu1 %vm3283_vm0, %v3284_v1  ;;  %2806 = vmatprep.mubr.msk.f32.mxu0 %vm3283_vm0, %v3284_v1 }
 0x33f   : > { %v1615_v48 = vpop.f32.mrb[2].mxu1  ;;  %v1694_v49 = vpop.f32.mrb[4].mxu0 }
 0x340   : > { %v2748_v50 = vpop.f32.mrb[3].mxu1  ;;  %v2755_v51 = vpop.f32.mrb[5].mxu0  ;;  %v1857_v52 = vsel %vm1856_vm4, %v1615_v48, -inf  ;;  %v1860_v53 = vsel %vm1856_vm4, %v1694_v49, -inf }
 0x341   : > { %1858 = vmax.xlane.f32.xlu1 %v1857_v52  ;;  %1861 = vmax.xlane.f32.xlu0 %v1860_v53 }
 0x347   : > { %v1773_v54 = vpop.f32.mrb[4].mxu1  ;;  %v1852_v55 = vpop.f32.mrb[6].mxu0 }
 0x348   : > { %v2762_v56 = vpop.f32.mrb[5].mxu1  ;;  %v2769_v57 = vpop.f32.mrb[7].mxu0  ;;  %v1863_v58 = vsel %vm1856_vm4, %v1773_v54, -inf  ;;  %v1866_v60 = vsel %vm1856_vm4, %v1852_v55, -inf }
 0x349   : > { %1864 = vmax.xlane.f32.xlu0 %v1863_v58  ;;  %1867 = vmax.xlane.f32.xlu1 %v1866_v60 }
 0x35a   : > { %1249 = vrot.lane.b32.xlu1 %v801_v62, %s3286_s24 }
 0x35e   : > { %1255 = vrot.lane.b32.xlu1 %v801_v62, %s3285_s6 }
 0x35f   : > { %1251 = vrot.lane.b32.xlu0 %v3800_v25, %s3286_s24  ;;  %s534_s24 = scalar_lea.vmem [#allocation14], %s2611_s30 }
 0x360   : > { %s2444_s22 = sshll.u32 %s534_s24, 4  ;;  %s3920_s22 = int_to_ptr.vmem [resolvable:$true] %s2444_s22 }
 0x361   : > { %s3193_s3 = scalar_lea.vmem %s3920_s22, 128 }
 0x362   : > { %1257 = vrot.lane.b32.xlu1 %v3800_v25, %s3285_s6  ;;  %s2658_s6 = sshll.u32 %s3375_s21, 7  ;;  %p3194_p5 = scmp.ne.s32.totalorder %s3920_s22, %s3193_s3 }
 0x363   : > { %1261 = vrot.lane.b32.xlu0 %v801_v62, %s3287_s16  ;;  %s3293_s21 = smov [#allocation14]  }
 0x364   : > { %p3195_p0 = pnand %p3194_p5, %p4047_p2  ;;  %s3197_s30 = sshll.u32 %s3293_s21, 4  ;;  %s3198_s30 = int_to_ptr.vmem [resolvable:$false] %s3197_s30 }
 0x365   : > { %s3199_s28 = scalar_lea.vmem %s3198_s30, 256  ;;  %p3200_p11 = scmp.lt.s32.totalorder %s3920_s22, %s3198_s30 }
 0x366   : > { %1263 = vrot.lane.b32.xlu1 %v3800_v25, %s3287_s16  ;;  %s4046_s16 = sld [smem:[#allocation33_spill]]  ;;  %p3196_p4 = pneg %p3195_p0 }
 0x367   : > { %p3201_p7 = scmp.lt.s32.totalorder %s3199_s28, %s3193_s3 }
 0x369   : > { %p3202_p9 = por %p3201_p7, %p3200_p11 }
 0x36b   : > { %p3203_p12 = pnand %p3202_p9, %p3196_p4 }
 0x36c   : > { %s3918_s15 = scalar_lea.hbm %s4046_s16, %s2658_s6 }
 0x3ce   : > { %v1859_v63 = vpop.xlane.xlu1 %1858  ;;  %v1862_v2 = vpop.xlane.xlu0 %1861 }
 0x3cf   : > { %v1869_v3 = vsub.f32 %v1615_v48, %v1859_v63  ;;  %v1870_v4 = vsub.f32 %v1694_v49, %v1862_v2 }
 0x3d1   : > { %v1873_v5 = vmul.f32 1.442695, %v1869_v3  ;;  %v1875_v6 = vmul.f32 1.442695, %v1870_v4 }
 0x3d3   : > { %2975 = vpow2.f32 %v1873_v5 }
 0x3d4   : > { %2977 = vpow2.f32 %v1875_v6 }
 0x3d6   : > { %v1865_v7 = vpop.xlane.xlu0 %1864  ;;  %v1868_v8 = vpop.xlane.xlu1 %1867 }
 0x3d7   : > { %v1871_v9 = vsub.f32 %v1773_v54, %v1865_v7  ;;  %v1872_v10 = vsub.f32 %v1852_v55, %v1868_v8 }
 0x3d9   : > { %v1877_v11 = vmul.f32 1.442695, %v1871_v9  ;;  %v1879_v12 = vmul.f32 1.442695, %v1872_v10 }
 0x3da   : > { %v1252_v13 = vpop.permute.xlu0 %1251  ;;  %v1250_v14 = vpop.permute.xlu1 %1249 }
 0x3db   : > { %2979 = vpow2.f32 %v1877_v11 }
 0x3dc   : > { %2981 = vpow2.f32 %v1879_v12 }
 0x3dd   : > { %v3810_v15 = vpop.eup %2975 }
 0x3de   : > { %v1262_v16 = vpop.permute.xlu0 %1261  ;;  %v1256_v17 = vpop.permute.xlu1 %1255  ;;  %v1881_v18 = vsel %vm1856_vm4, %v3810_v15, 0.0 }
 0x3df   : > { %v3814_v19 = vpop.eup %2977  ;;  %v1283_v20 = vcombine.low %v1250_v14, %v1262_v16  ;;  %v1284_v21 = vcombine.high %v1250_v14, %v1262_v16  ;;  %v1267_v22 = vcombine.low %v801_v62, %v1256_v17  ;;  %v1268_v23 = vcombine.high %v801_v62, %v1256_v17  ;;  %1882 = vadd.xlane.f32.xlu0 %v1881_v18 }
 0x3e0   : > { %v1884_v30 = vsel %vm1856_vm4, %v3814_v19, 0.0 }
 0x3e1   : > { %v1291_v24 = vrot.slane %v1283_v20, %v3711_v45  ;;  %v1298_v26 = vrot.slane %v1284_v21, %v3711_v45  ;;  %v1275_v27 = vrot.slane %v1267_v22, %v3711_v45  ;;  %v1282_v28 = vrot.slane %v1268_v23, %v3711_v45 }
 0x3e2   : > { %v1258_v29 = vpop.permute.xlu1 %1257 }
 0x3e3   : > { %v1299_v31 = vcombine.low %v1275_v27, %v1291_v24  ;;  %v1300_v32 = vcombine.high %v1275_v27, %v1291_v24  ;;  %v1315_v33 = vcombine.low %v1282_v28, %v1298_v26  ;;  %v1316_v34 = vcombine.high %v1282_v28, %v1298_v26  ;;  %1885 = vadd.xlane.f32.xlu0 %v1884_v30 }
 0x3e4   : > { %v1335_v41 = vcombine.low %v3800_v25, %v1258_v29  ;;  %v1336_v42 = vcombine.high %v3800_v25, %v1258_v29 }
 0x3e5   : > { %v3822_v35 = vpop.eup %2979  ;;  %v1307_v36 = vrot.slane %v1299_v31, %v3715_v59  ;;  %v1314_v37 = vrot.slane %v1300_v32, %v3715_v59  ;;  %v1323_v38 = vrot.slane %v1315_v33, %v3715_v59  ;;  %v1330_v39 = vrot.slane %v1316_v34, %v3715_v59 }
 0x3e6   : > { %v3828_v40 = vpop.eup %2981  ;;  %v1264_v43 = vpop.permute.xlu1 %1263  ;;  %v1887_v44 = vsel %vm1856_vm4, %v3822_v35, 0.0  ;;  %v1343_v57 = vrot.slane %v1335_v41, %v3711_v45  ;;  %v1350_v58 = vrot.slane %v1336_v42, %v3711_v45 }
 0x3e7   : > { %v1403_v46 = vcombine.low %v1307_v36, %v1314_v37  ;;  %v2633_v47 = vcombine.high %v1307_v36, %v1314_v37  ;;  %v1419_v48 = vcombine.low %v1323_v38, %v1330_v39  ;;  %v2634_v49 = vcombine.high %v1323_v38, %v1330_v39  ;;  %1888 = vadd.xlane.f32.xlu1 %v1887_v44 }
 0x3e8   : > { %v1351_v50 = vcombine.low %v1252_v13, %v1264_v43  ;;  %v1352_v51 = vcombine.high %v1252_v13, %v1264_v43  ;;  %v1890_v52 = vsel %vm1856_vm4, %v3828_v40, 0.0 }
 0x3e9   : > { %v1410_v53 = vrot.slane %v1403_v46, %v3711_v45  ;;  %v1418_v54 = vrot.slane %v2633_v47, %v3711_v45  ;;  %v1426_v55 = vrot.slane %v1419_v48, %v3711_v45  ;;  %v1434_v56 = vrot.slane %v2634_v49, %v3711_v45  ;;  %1891 = vadd.xlane.f32.xlu0 %v1890_v52 }
 0x3ea   : > { %v1359_v60 = vrot.slane %v1351_v50, %v3711_v45  ;;  %v1366_v61 = vrot.slane %v1352_v51, %v3711_v45 }
 0x3eb   : > { %v1435_v62 = vcombine.low %v1410_v53, %v1418_v54  ;;  %v1451_v25 = vcombine.low %v1426_v55, %v1434_v56  ;;  %v1436_v63 = vcombine.high %v1410_v53, %v1418_v54  ;;  %v1452_v2 = vcombine.high %v1426_v55, %v1434_v56 }
 0x3ec   : > { %v1367_v3 = vcombine.low %v1343_v57, %v1359_v60  ;;  %v1368_v4 = vcombine.high %v1343_v57, %v1359_v60  ;;  %v1383_v5 = vcombine.low %v1350_v58, %v1366_v61  ;;  %v1384_v6 = vcombine.high %v1350_v58, %v1366_v61  ;;  %v2345_v60 = vld [vmem:[%s4043_s13] sm:$0xff] }
 0x3ed   : > { %v1443_v7 = vrot.slane %v1435_v62, %v3715_v59  ;;  %v1459_v8 = vrot.slane %v1451_v25, %v3715_v59  ;;  %v1450_v9 = vrot.slane %v1436_v63, %v3715_v59  ;;  %v1466_v10 = vrot.slane %v1452_v2, %v3715_v59 }
 0x3ee   : > { %v1375_v11 = vrot.slane %v1367_v3, %v3715_v59  ;;  %v1382_v12 = vrot.slane %v1368_v4, %v3715_v59  ;;  %v1391_v13 = vrot.slane %v1383_v5, %v3715_v59  ;;  %v1398_v14 = vrot.slane %v1384_v6, %v3715_v59 }
 0x3ef   : > { %v1468_v16 = vcombine.high %v1443_v7, %v1459_v8  ;;  %v1469_v17 = vcombine.low %v1450_v9, %v1466_v10  ;;  %v1470_v18 = vcombine.high %v1450_v9, %v1466_v10  ;;  %v1467_v38 = vcombine.low %v1443_v7, %v1459_v8 }
 0x3f0   : > { %v1471_v20 = vcombine.low %v1375_v11, %v1382_v12  ;;  %v2635_v21 = vcombine.high %v1375_v11, %v1382_v12  ;;  %v1487_v22 = vcombine.low %v1391_v13, %v1398_v14  ;;  %v2636_v23 = vcombine.high %v1391_v13, %v1398_v14 }
 0x3f2   : > { %v1478_v24 = vrot.slane %v1471_v20, %v3711_v45  ;;  %v1486_v26 = vrot.slane %v2635_v21, %v3711_v45  ;;  %v1494_v27 = vrot.slane %v1487_v22, %v3711_v45  ;;  %v1502_v28 = vrot.slane %v2636_v23, %v3711_v45 }
 0x3f4   : > { %v1503_v29 = vcombine.low %v1478_v24, %v1486_v26  ;;  %v1519_v30 = vcombine.low %v1494_v27, %v1502_v28  ;;  %v1504_v31 = vcombine.high %v1478_v24, %v1486_v26  ;;  %v1520_v32 = vcombine.high %v1494_v27, %v1502_v28 }
 0x3f6   : > { %v1511_v33 = vrot.slane %v1503_v29, %v3715_v59  ;;  %v1527_v34 = vrot.slane %v1519_v30, %v3715_v59  ;;  %v1518_v36 = vrot.slane %v1504_v31, %v3715_v59  ;;  %v1534_v37 = vrot.slane %v1520_v32, %v3715_v59 }
 0x3f8   : > { %v1535_v39 = vcombine.low %v1511_v33, %v1527_v34  ;;  %v1536_v41 = vcombine.high %v1511_v33, %v1527_v34  ;;  %v1537_v42 = vcombine.low %v1518_v36, %v1534_v37  ;;  %v1538_v43 = vcombine.high %v1518_v36, %v1534_v37 }
 0x3fa   : > { %v2848_v44 = vpack.c.bf16 %v1535_v39, %v1467_v38  ;;  %v2851_v46 = vpack.c.bf16 %v1536_v41, %v1468_v16  ;;  %v2854_v47 = vpack.c.bf16 %v1537_v42, %v1469_v17  ;;  %v2857_v48 = vpack.c.bf16 %v1538_v43, %v1470_v18  ;;  %v2347_v17 = vld [vmem:[%s4043_s13 + $0x10] sm:$0xff]  ;;  %v2348_v18 = vld [vmem:[%s4043_s13 + $0x18] sm:$0xff] }
 0x3fb   : > { %v2863_v24 = vpack.c.bf16 %v2348_v18, %v2347_v17 }
 0x3fc   : > { %2849 = vmatpush3.bf16.msra.mxu1 %v2848_v44 }
 0x3fd   : > { %2850 = vmatprep.subr.bf16.mxu1 %v3282_v0 }
 0x46c   : > { %v1883_v49 = vpop.xlane.xlu0 %1882 }
 0x46d   : > { %2983 = vrcp.f32 %v1883_v49 }
 0x470   : > { %v1886_v50 = vpop.xlane.xlu0 %1885 }
 0x471   : > { %2985 = vrcp.f32 %v1886_v50 }
 0x474   : > { %v1889_v51 = vpop.xlane.xlu1 %1888 }
 0x475   : > { %2987 = vrcp.f32 %v1889_v51 }
 0x476   : > { %v1892_v52 = vpop.xlane.xlu0 %1891 }
 0x477   : > { %v2984_v53 = vpop.eup %2983  ;;  %2989 = vrcp.f32 %v1892_v52 }
 0x478   : > { %v1897_v54 = vmul.f32 %v2984_v53, %v3810_v15  ;;  %v2655_v53 = vld [vmem:[%s4045_s7] ss:$0 sm:$0xff] }
 0x47a   : > { %2775 = vmatmul.mubr.msk.f32.vlgmr.msra.gmra.mrb[6].mxu1 %vm1856_vm4, %v1897_v54 }
 0x47b   : > { %v2986_v55 = vpop.eup %2985  ;;  %2852 = vmatpush3.bf16.msra.mxu1 %v2851_v46  ;;  %2781 = vmatprep.mubr.msk.f32.mxu1 %vm3283_vm0, %v3284_v1 }
 0x47c   : > { %v1898_v56 = vmul.f32 %v2986_v55, %v3814_v19  ;;  %2853 = vmatprep.subr.bf16.mxu1 %v3282_v0 }
 0x47e   : > { %2782 = vmatmul.mubr.msk.f32.vlgmr.msra.gmra.mrb[8].mxu1 %vm1856_vm4, %v1898_v56 }
 0x47f   : > { %v2988_v57 = vpop.eup %2987  ;;  %2855 = vmatpush3.bf16.msra.mxu1 %v2854_v47  ;;  %2788 = vmatprep.mubr.msk.f32.mxu1 %vm3283_vm0, %v3284_v1 }
 0x480   : > { %v1899_v15 = vmul.f32 %v2988_v57, %v3822_v35  ;;  %2856 = vmatprep.subr.bf16.mxu1 %v3282_v0  ;;  %v2346_v35 = vld [vmem:[%s4043_s13 + $0x8] sm:$0xff] }
 0x481   : > { %v2990_v58 = vpop.eup %2989  ;;  %v2860_v61 = vpack.c.bf16 %v2346_v35, %v2345_v60 }
 0x482   : > { %2789 = vmatmul.mubr.msk.f32.vlgmr.msra.gmra.mrb[10].mxu1 %vm1856_vm4, %v1899_v15  ;;  %v1900_v19 = vmul.f32 %v2990_v58, %v3828_v40 }
 0x483   : > { %2858 = vmatpush3.bf16.msra.mxu1 %v2857_v48  ;;  %2795 = vmatprep.mubr.msk.f32.mxu1 %vm3283_vm0, %v3284_v1 }
 0x484   : > { %2861 = vmatpush3.bf16.msra.mxu0 %v2860_v61 }
 0x485   : > { %2862 = vmatprep.subr.bf16.mxu0 %v3282_v0 }
 0x486   : > { %2796 = vmatmul.mubr.msk.f32.vlgmr.msra.gmra.mrb[12].mxu1 %vm1856_vm4, %v1900_v19 }
 0x488   : > { %2864 = vmatpush3.bf16.msra.mxu0 %v2863_v24 }
 0x54d   : > { %v1970_v62 = vpop.f32.mrb[6].mxu1 }
 0x54e   : > { %v2776_v25 = vpop.f32.mrb[7].mxu1 }
 0x551   : > { %v2043_v63 = vpop.f32.mrb[8].mxu1 }
 0x552   : > { %v2783_v1 = vpop.f32.mrb[9].mxu1 }
 0x555   : > { %v2116_v2 = vpop.f32.mrb[10].mxu1 }
 0x556   : > { %v2193_v40 = vcombine.low %v1970_v62, %v2116_v2  ;;  %v2194_v3 = vcombine.high %v1970_v62, %v2116_v2  ;;  %v2790_v4 = vpop.f32.mrb[11].mxu1 }
 0x558   : > { %v2201_v9 = vrot.slane %v2193_v40, %v3711_v45  ;;  %v2208_v10 = vrot.slane %v2194_v3, %v3711_v45 }
 0x559   : > { %v2189_v5 = vpop.f32.mrb[12].mxu1 }
 0x55a   : > { %v2209_v6 = vcombine.low %v2043_v63, %v2189_v5  ;;  %v2210_v7 = vcombine.high %v2043_v63, %v2189_v5  ;;  %v2797_v8 = vpop.f32.mrb[13].mxu1 }
 0x55c   : > { %v2217_v11 = vrot.slane %v2209_v6, %v3711_v45  ;;  %v2224_v0 = vrot.slane %v2210_v7, %v3711_v45 }
 0x55e   : > { %v2225_v12 = vcombine.low %v2201_v9, %v2217_v11  ;;  %v2226_v13 = vcombine.high %v2201_v9, %v2217_v11  ;;  %v2241_v14 = vcombine.low %v2208_v10, %v2224_v0  ;;  %v2242_v16 = vcombine.high %v2208_v10, %v2224_v0 }
 0x560   : > { %v2233_v20 = vrot.slane %v2225_v12, %v3715_v59  ;;  %v2240_v21 = vrot.slane %v2226_v13, %v3715_v59  ;;  %v2249_v22 = vrot.slane %v2241_v14, %v3715_v59  ;;  %v2256_v23 = vrot.slane %v2242_v16, %v3715_v59 }
 0x562   : > { %v2261_v26 = vcombine.low %v2233_v20, %v2240_v21  ;;  %v2653_v27 = vcombine.high %v2233_v20, %v2240_v21  ;;  %v2277_v28 = vcombine.low %v2249_v22, %v2256_v23  ;;  %v2654_v29 = vcombine.high %v2249_v22, %v2256_v23 }
 0x564   : > { %v2268_v30 = vrot.slane %v2261_v26, %v3711_v45  ;;  %v2276_v31 = vrot.slane %v2653_v27, %v3711_v45  ;;  %v2284_v32 = vrot.slane %v2277_v28, %v3711_v45  ;;  %v2292_v33 = vrot.slane %v2654_v29, %v3711_v45 }
 0x566   : > { %v2294_v34 = vcombine.high %v2268_v30, %v2276_v31  ;;  %v2310_v36 = vcombine.high %v2284_v32, %v2292_v33  ;;  %v2293_v37 = vcombine.low %v2268_v30, %v2276_v31  ;;  %v2309_v38 = vcombine.low %v2284_v32, %v2292_v33 }
 0x568   : > { %v2308_v39 = vrot.slane %v2294_v34, %v3715_v59  ;;  %v2324_v41 = vrot.slane %v2310_v36, %v3715_v59  ;;  %v2301_v42 = vrot.slane %v2293_v37, %v3715_v59  ;;  %v2317_v43 = vrot.slane %v2309_v38, %v3715_v59 }
 0x56a   : > { %v2327_v44 = vcombine.low %v2308_v39, %v2324_v41  ;;  %v2326_v46 = vcombine.high %v2301_v42, %v2317_v43  ;;  %v2328_v47 = vcombine.high %v2308_v39, %v2324_v41  ;;  %v2325_v48 = vcombine.low %v2301_v42, %v2317_v43 }
 0x56c   : > { %2334 = vrot.lane.b32.xlu1 %v2327_v44, %s3290_s25  ;;  %2330 = vrot.lane.b32.xlu0 %v2326_v46, %s3291_s26 }
 0x570   : > { %2338 = vrot.lane.b32.xlu1 %v2328_v47, %s3292_s17 }
 0x5de   : > { %v2335_v45 = vpop.permute.xlu1 %2334  ;;  %v2331_v49 = vpop.permute.xlu0 %2330 }
 0x5df   : > { %v2341_v50 = vsel %vm1539_vm2, %v2325_v48, %v2331_v49 }
 0x5e0   : > { %v2342_v59 = vsel %vm1856_vm4, %v2341_v50, %v2335_v45 }
 0x5e2   : > { %v2339_v51 = vpop.permute.xlu1 %2338 }
 0x5e3   : > { %v2344_v52 = vsel %vm2343_vm5, %v2342_v59, %v2339_v51 }
 0x5e4   : > { %2807 = vmatmul.mubr.msk.f32.vlgmr.msra.gmra.mrb[8].mxu0 %vm551_vm1, %v2344_v52 }
 0x6b7   : > { %v2425_v54 = vpop.f32.mrb[8].mxu0 }
 0x6b8   : > { %v2426_v55 = vadd.f32 %v2655_v53, %v2425_v54  ;;  %v2808_v56 = vpop.f32.mrb[9].mxu0 }
 0x6ba   : > { %2429 = vst [vmem:[%s534_s24] sm:$0xff] %v2426_v55 }
 0x6bb   : > { %3206 = shalt.err (!%p3203_p12)
}
 0x6bc   : > { %s3207_s11 = scalar_lea.hbm %s3918_s15, 128  ;;  %s3211_s27 = scalar_lea.hbm %s4046_s16, 256 }
 0x6bd   : > { %p3208_p8 = scmp.ne.s32.totalorder %s3918_s15, %s3207_s11  ;;  %p3212_p1 = scmp.lt.u32.totalorder %s3918_s15, %s4046_s16 }
 0x6be   : > { %p3213_p6 = scmp.lt.u32.totalorder %s3211_s27, %s3207_s11  ;;  %p3215_p5 = scmp.lt.u32.totalorder %s3207_s11, %s3918_s15 }
 0x6bf   : > { %p3209_p10 = pnand %p3208_p8, %p4047_p2 }
 0x6c0   : > { %p3214_p3 = por %p3213_p6, %p3212_p1 }
 0x6c1   : > { %p3210_p13 = pneg %p3209_p10 }
 0x6c2   : > { %p3216_p0 = por %p3215_p5, %p3214_p3 }
 0x6c4   : > { %p3217_p4 = pnand %p3216_p0, %p3210_p13 }
 0x6c6   : > { %3220 = shalt.err (!%p3217_p4)
}
 0x6c7   : > { %2887 = dma.vmem_to_hbm [thread:$0]  (%p4047_p2), %s3920_s22, 128, %s3918_s15, %s2431_s4  }
 0x6c8 PF: > { %s4048_s26 = sld [smem:[#allocation20_spill]]  ;;  %s4049_s17 = sld [smem:[#allocation22_spill]] }
 0x6c9   : > { %p4051_p7 = scmp.ge.s32.totalorder %s3271_s20, 2 }
 0x6ce   : > { %s2456_s23 = sand.u32 1, %s4048_s26   ;;  %p4050_p11 = scmp.ne.s32.totalorder %s4049_s17, 0 }
 0x6cf   : > { %s2457_s10 = scalar_lea.sflag [#allocation4], %s2456_s23 }
 0x6d0   : > { %p2913_p9 = pnand %p4051_p7, %p4050_p11 }
 0x6d2   : > { %3254 = dma.done.wait (!%p2913_p9), %s2457_s10, 128  }
 0x6d3   : > { %3256 = vsyncadd (!%p2913_p9), %s2457_s10, 4294967168  ;;  %s4052_s20 = sld [smem:[#allocation23_spill]]  ;;  %s4053_s7 = sld [smem:[#allocation21_spill]] }
 0x6d4   : > { %s4054_s19 = sld [smem:[#allocation25_spill]]  ;;  %s4055_s17 = smov %s3263_s18 }
 0x6d9   : > { %p29_p12 = scmp.ge.s32.totalorder %s4052_s20, 4   ;;  %s4056_s18 = smov %s4053_s7 }
 0x6db   :  { %31 = sbr.rel (!%p29_p12) target bundleno = 18 (0x12), region = 149 }
 0x6e2   :  { %2462 = vsyncpa [#allocation3], 1 }
 0x6e3   :  { %2464 = vsyncpa [#allocation3 + $0x1], 1 }
 0x6e4   :  { %2465 = vsyncpa [#allocation6], 1 }
 0x6e5   :  { %2467 = vsyncpa [#allocation6 + $0x1], 1 }
 0x6e6   :  { %2468 = vsyncpa [#allocation9], 1 }
 0x6e7   :  { %2469 = vsyncpa [#allocation12], 1 }
 0x6e8   :  { %2470 = vsyncpa [#allocation4], 1 }
 0x6e9   :  { %2472 = vsyncpa [#allocation4 + $0x1], 1 }

</bundles_post_ra>
